<compile_context>
chip_gen: v5e
topology: v5e:2x2
jax: 0.10.0
libtpu: 0.0.40
codegen_flags: <defaults>
</compile_context>

<pallas_src>
import functools
import numpy as np
import jax
import jax.numpy as jnp
from jax import lax
from jax.experimental import pallas as pl
from jax.experimental.pallas import tpu as pltpu

LEAKY_ALPHA = 0.01  # nn.LeakyReLU(alpha=0.01)


# ----------------------------------------------------------------------------
# Kernel A: MAGNN_mptype_layer hot path, one grid step per metapath type.
#   RotatE0 instance encoder (complex rotation in split [re|im] layout + mean
#   over path positions), fused attention score, LeakyReLU, exact per-node
#   edge softmax, attention-weighted segment sum (message passing).
# ----------------------------------------------------------------------------
def _mptype_kernel(edata_ref, rota_ref, rotb_ref, csel_ref, w12t_ref, adj_ref,
                   out_ref, *, D, H):
    x = edata_ref[...]                                    # (E, Lmax, D) f32
    # complex rotation in split layout: swap the re/im halves on the XLU
    xs = pltpu.roll(x, D // 2, 2)                         # [im | re]
    # rotA/rotB are (Lmax, D), include the 1/L mean factor, 0 on padded rows
    rot = x * rota_ref[...] + xs * rotb_ref[...]          # (E, Lmax, D)
    hidden = jnp.sum(rot, axis=1)                         # (E, D) == mean over L
    center = jnp.sum(x * csel_ref[...], axis=1)           # (E, D) center node row

    # fused attention score: [center | hidden] @ [attn1 ; attn2]
    ch = jnp.concatenate([center, hidden], axis=-1).astype(jnp.bfloat16)  # (E, 2D)
    w = w12t_ref[...].astype(jnp.bfloat16)                # (H, 2D)
    dn = (((1,), (1,)), ((), ()))                         # contract the 2D axis
    a = lax.dot_general(ch, w, dn, preferred_element_type=jnp.float32)   # (E, H)
    aT = lax.dot_general(w, ch, dn, preferred_element_type=jnp.float32)  # (H, E)
    a = jnp.where(a > 0, a, LEAKY_ALPHA * a)              # LeakyReLU
    aT = jnp.where(aT > 0, aT, LEAKY_ALPHA * aT)

    adj = adj_ref[...]                                    # (N, E) one-hot dst, f32
    # exact per-destination-node max (DGL edge_softmax stabilization)
    node_max = jnp.concatenate(
        [jnp.max(jnp.where(adj > 0.0, aT[h:h + 1, :], -1e30),
                 axis=1, keepdims=True) for h in range(H)], axis=-1)     # (N, H)
    dn_t = (((0,), (0,)), ((), ()))                       # contract over N (adj^T @ .)
    edge_max = lax.dot_general(adj, node_max, dn_t,
                               preferred_element_type=jnp.float32)       # (E, H)
    p = jnp.exp(a - edge_max)                             # (E, H)

    adj_b = adj.astype(jnp.bfloat16)
    node_sum = jnp.dot(adj_b, p.astype(jnp.bfloat16),
                       preferred_element_type=jnp.float32)               # (N, H)
    edge_sum = lax.dot_general(adj, node_sum, dn_t,
                               preferred_element_type=jnp.float32)       # (E, H)
    att = p * pl.reciprocal(edge_sum, approx=True)        # (E, H)

    # message passing: one wide matmul + one lane-dense (H*D = 256) store
    weighted = jnp.concatenate([att[:, h:h + 1] * hidden for h in range(H)],
                               axis=-1).astype(jnp.bfloat16)             # (E, H*D)
    out_ref[...] = jnp.dot(adj_b, weighted, preferred_element_type=jnp.float32)


def run_mptype(edata, rota, rotb, csel, w12t, adj, *, P, E, Lmax, D, H, N):
    kern = functools.partial(_mptype_kernel, D=D, H=H)
    return pl.pallas_call(
        kern,
        out_shape=jax.ShapeDtypeStruct((P, N, H * D), jnp.float32),
        grid=(P,),
        in_specs=[
            pl.BlockSpec((None, E, Lmax, D), lambda p: (p, 0, 0, 0)),
            pl.BlockSpec((None, Lmax, D), lambda p: (p, 0, 0)),
            pl.BlockSpec((None, Lmax, D), lambda p: (p, 0, 0)),
            pl.BlockSpec((None, Lmax, 1), lambda p: (p, 0, 0)),
            pl.BlockSpec((None, H, 2 * D), lambda p: (p, 0, 0)),
            pl.BlockSpec((None, N, E), lambda p: (p, 0, 0)),
        ],
        out_specs=pl.BlockSpec((None, N, H * D), lambda p: (p, 0, 0)),
        compiler_params=pltpu.CompilerParams(
            dimension_semantics=("parallel",),          # 2 metapaths -> 2 TCs on v7x
            vmem_limit_bytes=32 * 1024 * 1024),
    )(edata, rota, rotb, csel, w12t, adj)


# ----------------------------------------------------------------------------
# Kernel B: MAGNN_ntype_layer combine (ELU, tanh(fc1), mean, fc2, softmax beta,
# weighted sum over metapath types) fused with the MAGNN_layer output
# transform elu(x @ W.T + b).  Fully batched over P (no per-P matmuls).
# ----------------------------------------------------------------------------
def _ntype_out_kernel(x_ref, w1_ref, b1_ref, w2_ref, wo_ref, bo_ref, out_ref,
                      *, P, N):
    x = x_ref[...]                                        # (P*N, H*D)
    # ELU (jnp.exp(x)-1 keeps the previously validated lowering; expm1 would be
    # marginally more accurate near 0)
    ex = jnp.where(x > 0, x, jnp.exp(x) - 1.0)
    exb = ex.astype(jnp.bfloat16)
    f1 = jnp.tanh(jnp.dot(exb, w1_ref[...].astype(jnp.bfloat16),
                          preferred_element_type=jnp.float32) + b1_ref[...])  # (P*N, A)
    m = jnp.mean(f1.reshape(P, N, f1.shape[-1]), axis=1)  # (P, A)
    s = jnp.dot(m.astype(jnp.bfloat16), w2_ref[...].astype(jnp.bfloat16),
                preferred_element_type=jnp.float32)       # (P, 1)
    e = jnp.exp(s - jnp.max(s, axis=0, keepdims=True))
    beta = e * pl.reciprocal(jnp.sum(e, axis=0, keepdims=True), approx=True)  # (P, 1)
    comb = jnp.sum(beta.reshape(P, 1, 1) * ex.reshape(P, N, ex.shape[-1]),
                   axis=0)                                # (N, H*D)
    y = jnp.dot(comb.astype(jnp.bfloat16), wo_ref[...].astype(jnp.bfloat16),
                preferred_element_type=jnp.float32) + bo_ref[...]             # (N, D)
    out_ref[...] = jnp.where(y > 0, y, jnp.exp(y) - 1.0)  # final ELU


def run_ntype_out(x2d, w1, b1, w2, wo, bo, *, P, N):
    kern = functools.partial(_ntype_out_kernel, P=P, N=N)
    vmem = pl.BlockSpec(memory_space=pltpu.MemorySpace.VMEM)
    return pl.pallas_call(
        kern,
        out_shape=jax.ShapeDtypeStruct((N, wo.shape[1]), jnp.float32),
        in_specs=[vmem] * 6,
        out_specs=pl.BlockSpec(memory_space=pltpu.MemorySpace.VMEM),
    )(x2d, w1, b1, w2, wo, bo)


# ----------------------------------------------------------------------------
# Plain-JAX / numpy glue: RotatE0 relation vectors, rotation coefficients in
# split layout, one-hot adjacency, deterministic parameter init, and the
# interleaved -> split lane permutation applied consistently to weights.
# ----------------------------------------------------------------------------
def xavier(key, shape, fan_in, fan_out, gain=1.414):
    std = gain * (2.0 / (fan_in + fan_out)) ** 0.5
    return (std * jax.random.normal(key, shape)).astype(jnp.float32)


def expand_rvec_rotate0(rvec):
    # F.normalize(rvec, p=2, dim=2) then stack (r, conj(r)) -> (num_etype, D/2, 2)
    norm = jnp.sqrt(jnp.sum(rvec * rvec, axis=2, keepdims=True))
    rv = rvec / jnp.maximum(norm, 1e-12)
    rv2 = jnp.stack([rv, rv], axis=1)
    rv2 = rv2.at[:, 1, :, 1].multiply(-1.0)
    return rv2.reshape(-1, rvec.shape[1], 2)


def compute_final_rvec(rvec_exp, etypes, L):
    Dh = rvec_exp.shape[1]
    fr = [None] * L
    fr[L - 1] = jnp.concatenate(
        [jnp.ones((Dh, 1), jnp.float32), jnp.zeros((Dh, 1), jnp.float32)], axis=1)
    for i in range(L - 2, -1, -1):
        e = etypes[i]
        if e is None:
            fr[i] = fr[i + 1]
        else:
            re = fr[i + 1][:, 0] * rvec_exp[e, :, 0] - fr[i + 1][:, 1] * rvec_exp[e, :, 1]
            im = fr[i + 1][:, 0] * rvec_exp[e, :, 1] + fr[i + 1][:, 1] * rvec_exp[e, :, 0]
            fr[i] = jnp.stack([re, im], axis=1)
    return jnp.stack(fr, axis=0)                          # (L, D/2, 2)


def rot_coeffs_split(fr, L, Lmax):
    # split [re | im] lane layout; 1/L mean factor folded in; padded rows are 0
    re, im = fr[:, :, 0], fr[:, :, 1]                     # (L, D/2)
    A = jnp.concatenate([re, re], axis=1) / float(L)      # (L, D)
    B = jnp.concatenate([-im, im], axis=1) / float(L)
    pad = ((0, Lmax - L), (0, 0))
    return jnp.pad(A, pad), jnp.pad(B, pad)


if __name__ == "__main__":
    # hdim=128, nhead=2, adim=16  ->  H*D = 256 and D = 128 (lane-dense outputs)
    N_NODES, D, H, ADIM = 8, 128, 2, 16
    NUM_ETYPE, E = 4, 16
    mptypes = {"m1": dict(etypes=[0, 3], L=3), "m2": dict(etypes=[2], L=2)}
    P = len(mptypes)
    Lmax = max(cfg["L"] for cfg in mptypes.values())

    keys = jax.random.split(jax.random.PRNGKey(0), 16)
    emb = jax.random.normal(keys[0], (N_NODES, D), jnp.float32)        # nn.Embedding
    rvec = xavier(keys[1], (NUM_ETYPE // 2, D // 2, 2), D // 2, 2)     # RotatE0 rvec
    attn1 = {"m1": xavier(keys[2], (H, D), D, H),
             "m2": xavier(keys[3], (H, D), D, H)}
    attn2 = {"m1": xavier(keys[4], (1, H, D), H, D),
             "m2": xavier(keys[5], (1, H, D), H, D)}
    fc1_w = xavier(keys[6], (ADIM, H * D), H * D, ADIM)
    fc1_b = jnp.zeros((1, ADIM), jnp.float32)
    fc2_w = xavier(keys[7], (1, ADIM), ADIM, 1)
    fc_w = xavier(keys[8], (D, H * D), H * D, D)
    fc_b = jnp.zeros((1, D), jnp.float32)

    # metapath instances; last node of each instance is the destination/center
    # node; every node is a target (in node-id order) with 2 instances each.
    mpinst = {"m1": np.array(jax.random.randint(keys[9], (E, 3), 0, N_NODES)),
              "m2": np.array(jax.random.randint(keys[10], (E, 2), 0, N_NODES))}
    for m in mpinst:
        mpinst[m][:, -1] = np.arange(E) % N_NODES

    # interleaved (re,im,re,im,...) -> split ([re...|im...]) lane permutation;
    # applied to node features and compensated in every weight that consumes
    # node-feature space, so the forward pass is unchanged.
    perm = np.concatenate([np.arange(0, D, 2), np.arange(1, D, 2)])
    full_perm = np.concatenate([perm + h * D for h in range(H)])
    node_feat = emb[:, perm]                              # (N, D) split layout
    rvec_exp = expand_rvec_rotate0(rvec)

    edata_l, rota_l, rotb_l, csel_l, w12t_l, adj_l = [], [], [], [], [], []
    for m, cfg in mptypes.items():
        L = cfg["L"]
        inst = np.zeros((E, Lmax), np.int32)
        inst[:, :L] = mpinst[m]
        edata_l.append(node_feat[jnp.asarray(inst)])      # (E, Lmax, D)
        fr = compute_final_rvec(rvec_exp, cfg["etypes"], L)
        A, B = rot_coeffs_split(fr, L, Lmax)
        rota_l.append(A)
        rotb_l.append(B)
        cs = np.zeros((Lmax, 1), np.float32)
        cs[L - 1, 0] = 1.0                                # one-hot center selector
        csel_l.append(jnp.asarray(cs))
        w1 = attn1[m].T[perm]                             # (D, H)
        w2 = attn2[m][0].T[perm]                          # (D, H)
        w12t_l.append(jnp.concatenate([w1, w2], axis=0).T)  # (H, 2D)
        dst = mpinst[m][:, -1]
        adj = np.zeros((N_NODES, E), np.float32)
        adj[dst, np.arange(E)] = 1.0
        adj_l.append(jnp.asarray(adj))

    edata_all = jnp.stack(edata_l)                        # (P, E, Lmax, D)
    rota_all = jnp.stack(rota_l)                          # (P, Lmax, D)
    rotb_all = jnp.stack(rotb_l)                          # (P, Lmax, D)
    csel_all = jnp.stack(csel_l)                          # (P, Lmax, 1)
    w12t_all = jnp.stack(w12t_l)                          # (P, H, 2D)
    adj_all = jnp.stack(adj_l)                            # (P, N, E)

    ft_all = run_mptype(edata_all, rota_all, rotb_all, csel_all, w12t_all,
                        adj_all, P=P, E=E, Lmax=Lmax, D=D, H=H, N=N_NODES)

    out = run_ntype_out(ft_all.reshape(P * N_NODES, H * D),
                        fc1_w.T[full_perm], fc1_b, fc2_w.T,
                        fc_w.T[full_perm], fc_b, P=P, N=N_NODES)   # (N, D)
    out = jax.block_until_ready(out)
    assert out.shape == (N_NODES, D)
    assert bool(jnp.all(jnp.isfinite(out)))
    print("KERNEL_OK")
</pallas_src>

<mosaic_0001>
module attributes {stable_mosaic.version = 11 : i64} {
  func.func @_mptype_kernel(%arg0: i32, %arg1: memref<1x16x3x128xf32, #tpu.memory_space<vmem>>, %arg2: memref<1x3x128xf32, #tpu.memory_space<vmem>>, %arg3: memref<1x3x128xf32, #tpu.memory_space<vmem>>, %arg4: memref<1x3x1xf32, #tpu.memory_space<vmem>>, %arg5: memref<1x2x256xf32, #tpu.memory_space<vmem>>, %arg6: memref<1x8x16xf32, #tpu.memory_space<vmem>>, %arg7: memref<1x8x256xf32, #tpu.memory_space<vmem>>) attributes {dimension_semantics = [#tpu.dimension_semantics<parallel>], iteration_bounds = array<i64: 2>, scalar_prefetch = 0 : i64, scratch_operands = 0 : i64, tpu.core_type = #tpu.core_type<tc>, window_params = [{transform_indices = @transform_0, window_bounds = array<i64: 1, 16, 3, 128>}, {transform_indices = @transform_1, window_bounds = array<i64: 1, 3, 128>}, {transform_indices = @transform_2, window_bounds = array<i64: 1, 3, 128>}, {transform_indices = @transform_3, window_bounds = array<i64: 1, 3, 1>}, {transform_indices = @transform_4, window_bounds = array<i64: 1, 2, 256>}, {transform_indices = @transform_5, window_bounds = array<i64: 1, 8, 16>}, {transform_indices = @transform_6, window_bounds = array<i64: 1, 8, 256>}]} {
    %c0 = arith.constant 0 : index
    %c0_0 = arith.constant 0 : index
    %c0_1 = arith.constant 0 : index
    %c0_2 = arith.constant 0 : index
    %0 = vector.load %arg1[%c0, %c0_0, %c0_1, %c0_2] : memref<1x16x3x128xf32, #tpu.memory_space<vmem>>, vector<1x16x3x128xf32>
    %1 = vector.shape_cast %0 : vector<1x16x3x128xf32> to vector<16x3x128xf32>
    %c64_i32 = arith.constant 64 : i32
    %2 = tpu.dynamic_rotate %1 by %c64_i32 dim 2 : vector<16x3x128xf32>, i32 -> vector<16x3x128xf32>
    %c0_3 = arith.constant 0 : index
    %c0_4 = arith.constant 0 : index
    %c0_5 = arith.constant 0 : index
    %3 = vector.load %arg2[%c0_3, %c0_4, %c0_5] : memref<1x3x128xf32, #tpu.memory_space<vmem>>, vector<1x3x128xf32>
    %4 = vector.shape_cast %3 : vector<1x3x128xf32> to vector<3x128xf32>
    %5 = vector.shape_cast %4 : vector<3x128xf32> to vector<1x3x128xf32>
    %6 = vector.broadcast %5 : vector<1x3x128xf32> to vector<16x3x128xf32>
    %7 = arith.mulf %1, %6 : vector<16x3x128xf32>
    %c0_6 = arith.constant 0 : index
    %c0_7 = arith.constant 0 : index
    %c0_8 = arith.constant 0 : index
    %8 = vector.load %arg3[%c0_6, %c0_7, %c0_8] : memref<1x3x128xf32, #tpu.memory_space<vmem>>, vector<1x3x128xf32>
    %9 = vector.shape_cast %8 : vector<1x3x128xf32> to vector<3x128xf32>
    %10 = vector.shape_cast %9 : vector<3x128xf32> to vector<1x3x128xf32>
    %11 = vector.broadcast %10 : vector<1x3x128xf32> to vector<16x3x128xf32>
    %12 = arith.mulf %2, %11 : vector<16x3x128xf32>
    %13 = arith.addf %7, %12 : vector<16x3x128xf32>
    %cst = arith.constant dense<0.000000e+00> : vector<16x128xf32>
    %14 = vector.multi_reduction <add>, %13, %cst [1] : vector<16x3x128xf32> to vector<16x128xf32>
    %c0_9 = arith.constant 0 : index
    %c0_10 = arith.constant 0 : index
    %c0_11 = arith.constant 0 : index
    %15 = vector.load %arg4[%c0_9, %c0_10, %c0_11] : memref<1x3x1xf32, #tpu.memory_space<vmem>>, vector<1x3x1xf32>
    %16 = vector.shape_cast %15 : vector<1x3x1xf32> to vector<3x1xf32>
    %17 = vector.shape_cast %16 : vector<3x1xf32> to vector<1x3x1xf32>
    %18 = vector.broadcast %17 : vector<1x3x1xf32> to vector<16x3x128xf32>
    %19 = arith.mulf %1, %18 : vector<16x3x128xf32>
    %cst_12 = arith.constant dense<0.000000e+00> : vector<16x128xf32>
    %20 = vector.multi_reduction <add>, %19, %cst_12 [1] : vector<16x3x128xf32> to vector<16x128xf32>
    %21 = tpu.concatenate %20, %14 in 1 : vector<16x128xf32>, vector<16x128xf32> -> vector<16x256xf32>
    %22 = arith.truncf %21 : vector<16x256xf32> to vector<16x256xbf16>
    %c0_13 = arith.constant 0 : index
    %c0_14 = arith.constant 0 : index
    %c0_15 = arith.constant 0 : index
    %23 = vector.load %arg5[%c0_13, %c0_14, %c0_15] : memref<1x2x256xf32, #tpu.memory_space<vmem>>, vector<1x2x256xf32>
    %24 = vector.shape_cast %23 : vector<1x2x256xf32> to vector<2x256xf32>
    %25 = arith.truncf %24 : vector<2x256xf32> to vector<2x256xbf16>
    %cst_16 = arith.constant dense<0.000000e+00> : vector<16x2xf32>
    %26 = tpu.matmul %22, %25, %cst_16 {dimension_numbers = #tpu.dot_dimension_numbers<[1], [1], [0], [0], [0, 0, 1, 0], [], []>} : vector<16x256xbf16>, vector<2x256xbf16>, vector<16x2xf32> -> vector<16x2xf32>
    %cst_17 = arith.constant dense<0.000000e+00> : vector<2x16xf32>
    %27 = tpu.matmul %25, %22, %cst_17 {dimension_numbers = #tpu.dot_dimension_numbers<[1], [1], [0], [0], [0, 0, 1, 0], [], []>} : vector<2x256xbf16>, vector<16x256xbf16>, vector<2x16xf32> -> vector<2x16xf32>
    %cst_18 = arith.constant 0.000000e+00 : f32
    %28 = vector.broadcast %cst_18 : f32 to vector<16x2xf32>
    %29 = arith.cmpf ogt, %26, %28 : vector<16x2xf32>
    %cst_19 = arith.constant 0.00999999977 : f32
    %30 = vector.broadcast %cst_19 : f32 to vector<16x2xf32>
    %31 = arith.mulf %30, %26 : vector<16x2xf32>
    %32 = arith.select %29, %26, %31 : vector<16x2xi1>, vector<16x2xf32>
    %cst_20 = arith.constant 0.000000e+00 : f32
    %33 = vector.broadcast %cst_20 : f32 to vector<2x16xf32>
    %34 = arith.cmpf ogt, %27, %33 : vector<2x16xf32>
    %cst_21 = arith.constant 0.00999999977 : f32
    %35 = vector.broadcast %cst_21 : f32 to vector<2x16xf32>
    %36 = arith.mulf %35, %27 : vector<2x16xf32>
    %37 = arith.select %34, %27, %36 : vector<2x16xi1>, vector<2x16xf32>
    %c0_22 = arith.constant 0 : index
    %c0_23 = arith.constant 0 : index
    %c0_24 = arith.constant 0 : index
    %38 = vector.load %arg6[%c0_22, %c0_23, %c0_24] : memref<1x8x16xf32, #tpu.memory_space<vmem>>, vector<1x8x16xf32>
    %39 = vector.shape_cast %38 : vector<1x8x16xf32> to vector<8x16xf32>
    %cst_25 = arith.constant 0.000000e+00 : f32
    %40 = vector.broadcast %cst_25 : f32 to vector<8x16xf32>
    %41 = arith.cmpf ogt, %39, %40 : vector<8x16xf32>
    %42 = vector.extract_strided_slice %37 {offsets = [0, 0], sizes = [1, 16], strides = [1, 1]} : vector<2x16xf32> to vector<1x16xf32>
    %cst_26 = arith.constant -1.000000e+30 : f32
    %43 = vector.shape_cast %42 : vector<1x16xf32> to vector<1x16xf32>
    %44 = vector.broadcast %43 : vector<1x16xf32> to vector<8x16xf32>
    %45 = vector.broadcast %cst_26 : f32 to vector<8x16xf32>
    %46 = arith.select %41, %44, %45 : vector<8x16xi1>, vector<8x16xf32>
    %cst_27 = arith.constant dense<0xFF800000> : vector<8xf32>
    %47 = vector.multi_reduction <maximumf>, %46, %cst_27 [1] : vector<8x16xf32> to vector<8xf32>
    %48 = vector.shape_cast %47 : vector<8xf32> to vector<8x1xf32>
    %cst_28 = arith.constant 0.000000e+00 : f32
    %49 = vector.broadcast %cst_28 : f32 to vector<8x16xf32>
    %50 = arith.cmpf ogt, %39, %49 : vector<8x16xf32>
    %51 = vector.extract_strided_slice %37 {offsets = [1, 0], sizes = [1, 16], strides = [1, 1]} : vector<2x16xf32> to vector<1x16xf32>
    %cst_29 = arith.constant -1.000000e+30 : f32
    %52 = vector.shape_cast %51 : vector<1x16xf32> to vector<1x16xf32>
    %53 = vector.broadcast %52 : vector<1x16xf32> to vector<8x16xf32>
    %54 = vector.broadcast %cst_29 : f32 to vector<8x16xf32>
    %55 = arith.select %50, %53, %54 : vector<8x16xi1>, vector<8x16xf32>
    %cst_30 = arith.constant dense<0xFF800000> : vector<8xf32>
    %56 = vector.multi_reduction <maximumf>, %55, %cst_30 [1] : vector<8x16xf32> to vector<8xf32>
    %57 = vector.shape_cast %56 : vector<8xf32> to vector<8x1xf32>
    %58 = tpu.concatenate %48, %57 in 1 : vector<8x1xf32>, vector<8x1xf32> -> vector<8x2xf32>
    %cst_31 = arith.constant dense<0.000000e+00> : vector<16x2xf32>
    %59 = tpu.matmul %39, %58, %cst_31 {dimension_numbers = #tpu.dot_dimension_numbers<[0], [0], [1], [1], [0, 1, 1, 1], [], []>} : vector<8x16xf32>, vector<8x2xf32>, vector<16x2xf32> -> vector<16x2xf32>
    %60 = arith.subf %32, %59 : vector<16x2xf32>
    %61 = math.exp %60 : vector<16x2xf32>
    %62 = arith.truncf %39 : vector<8x16xf32> to vector<8x16xbf16>
    %63 = arith.truncf %61 : vector<16x2xf32> to vector<16x2xbf16>
    %cst_32 = arith.constant dense<0.000000e+00> : vector<8x2xf32>
    %64 = tpu.matmul %62, %63, %cst_32 {dimension_numbers = #tpu.dot_dimension_numbers<[1], [0], [0], [1], [0, 0, 1, 1], [], []>} : vector<8x16xbf16>, vector<16x2xbf16>, vector<8x2xf32> -> vector<8x2xf32>
    %cst_33 = arith.constant dense<0.000000e+00> : vector<16x2xf32>
    %65 = tpu.matmul %39, %64, %cst_33 {dimension_numbers = #tpu.dot_dimension_numbers<[0], [0], [1], [1], [0, 1, 1, 1], [], []>} : vector<8x16xf32>, vector<8x2xf32>, vector<16x2xf32> -> vector<16x2xf32>
    %66 = tpu.reciprocal %65 {approx = true} : vector<16x2xf32> -> vector<16x2xf32>
    %67 = arith.mulf %61, %66 : vector<16x2xf32>
    %68 = vector.extract_strided_slice %67 {offsets = [0, 0], sizes = [16, 1], strides = [1, 1]} : vector<16x2xf32> to vector<16x1xf32>
    %69 = vector.broadcast %68 : vector<16x1xf32> to vector<16x128xf32>
    %70 = arith.mulf %69, %14 : vector<16x128xf32>
    %71 = vector.extract_strided_slice %67 {offsets = [0, 1], sizes = [16, 1], strides = [1, 1]} : vector<16x2xf32> to vector<16x1xf32>
    %72 = vector.broadcast %71 : vector<16x1xf32> to vector<16x128xf32>
    %73 = arith.mulf %72, %14 : vector<16x128xf32>
    %74 = tpu.concatenate %70, %73 in 1 : vector<16x128xf32>, vector<16x128xf32> -> vector<16x256xf32>
    %75 = arith.truncf %74 : vector<16x256xf32> to vector<16x256xbf16>
    %cst_34 = arith.constant dense<0.000000e+00> : vector<8x256xf32>
    %76 = tpu.matmul %62, %75, %cst_34 {dimension_numbers = #tpu.dot_dimension_numbers<[1], [0], [0], [1], [0, 0, 1, 1], [], []>} : vector<8x16xbf16>, vector<16x256xbf16>, vector<8x256xf32> -> vector<8x256xf32>
    %c0_35 = arith.constant 0 : index
    %c0_36 = arith.constant 0 : index
    %c0_37 = arith.constant 0 : index
    %77 = vector.load %arg7[%c0_35, %c0_36, %c0_37] : memref<1x8x256xf32, #tpu.memory_space<vmem>>, vector<1x8x256xf32>
    %78 = vector.shape_cast %77 : vector<1x8x256xf32> to vector<8x256xf32>
    %79 = vector.shape_cast %76 : vector<8x256xf32> to vector<1x8x256xf32>
    tpu.vector_store %arg7[%c0_35, %c0_36, %c0_37], %79 {strides = array<i32>} : memref<1x8x256xf32, #tpu.memory_space<vmem>>, vector<1x8x256xf32>,
    return
  }
  func.func @transform_0(%arg0: i32) -> (i32, i32, i32, i32) {
    %c0_i32 = arith.constant 0 : i32
    %c0_i32_0 = arith.constant 0 : i32
    %c0_i32_1 = arith.constant 0 : i32
    %c0_i32_2 = arith.constant 0 : i32
    return %arg0, %c0_i32, %c0_i32_0, %c0_i32_1 : i32, i32, i32, i32
  }
  func.func @transform_1(%arg0: i32) -> (i32, i32, i32) {
    %c0_i32 = arith.constant 0 : i32
    %c0_i32_0 = arith.constant 0 : i32
    %c0_i32_1 = arith.constant 0 : i32
    return %arg0, %c0_i32, %c0_i32_0 : i32, i32, i32
  }
  func.func @transform_2(%arg0: i32) -> (i32, i32, i32) {
    %c0_i32 = arith.constant 0 : i32
    %c0_i32_0 = arith.constant 0 : i32
    %c0_i32_1 = arith.constant 0 : i32
    return %arg0, %c0_i32, %c0_i32_0 : i32, i32, i32
  }
  func.func @transform_3(%arg0: i32) -> (i32, i32, i32) {
    %c0_i32 = arith.constant 0 : i32
    %c0_i32_0 = arith.constant 0 : i32
    %c0_i32_1 = arith.constant 0 : i32
    return %arg0, %c0_i32, %c0_i32_0 : i32, i32, i32
  }
  func.func @transform_4(%arg0: i32) -> (i32, i32, i32) {
    %c0_i32 = arith.constant 0 : i32
    %c0_i32_0 = arith.constant 0 : i32
    %c0_i32_1 = arith.constant 0 : i32
    return %arg0, %c0_i32, %c0_i32_0 : i32, i32, i32
  }
  func.func @transform_5(%arg0: i32) -> (i32, i32, i32) {
    %c0_i32 = arith.constant 0 : i32
    %c0_i32_0 = arith.constant 0 : i32
    %c0_i32_1 = arith.constant 0 : i32
    return %arg0, %c0_i32, %c0_i32_0 : i32, i32, i32
  }
  func.func @transform_6(%arg0: i32) -> (i32, i32, i32) {
    %c0_i32 = arith.constant 0 : i32
    %c0_i32_0 = arith.constant 0 : i32
    %c0_i32_1 = arith.constant 0 : i32
    return %arg0, %c0_i32, %c0_i32_0 : i32, i32, i32
  }
}

</mosaic_0001>

<bundles_post_ra>
// kernel: tpu_custom_call.1
= control target key start
LH: loop header
LB: loop body
LE: loop exit
PB: predicated region body
PF: predicated region fallthrough
CT: control target
= control target key end

     0   :  { %11 = vsyncpa [#allocation3], 0  ;;  %s1782_s0 = inlined_call_operand.vmem [shape: f32[2,16,3,128], index: 0, kind: input, shape index: {}]   ;;  %s1783_s1 = inlined_call_operand.vmem [shape: f32[2,3,128], index: 1, kind: input, shape index: {}]   ;;  %s1784_s2 = inlined_call_operand.vmem [shape: f32[2,3,128], index: 2, kind: input, shape index: {}]   ;;  %s1785_s3 = inlined_call_operand.vmem [shape: f32[2,3,1], index: 3, kind: input, shape index: {}]   ;;  %s1786_s4 = inlined_call_operand.vmem [shape: f32[2,2,256], index: 4, kind: input, shape index: {}]   ;;  %s1787_s5 = inlined_call_operand.vmem [shape: f32[2,8,16], index: 5, kind: input, shape index: {}]   ;;  %s1788_s6 = inlined_call_operand.hbm [shape: f32[2,8,256], index: 6, kind: output, shape index: {}]  }
   0x1   :  { %13 = vsyncpa [#allocation3 + $0x1], 0  ;;  %s1332_s21 = smov 0   ;;  %s1334_s22 = smov 0  }
   0x2   :  { %s1336_s23 = smov 0   ;;  %s1338_s24 = smov 0  }
   0x3 LB: > { %s1353_s25 = sadd.s32 4294967295, %s1292_s24   ;;  %s1145_s26 = sadd.s32 4294967294, %s1292_s24   ;;  %s1292_s24 = sphi %s1338_s24, %s1794_s24   ;;  %s1288_s23 = sphi %s1336_s23, %s1793_s23   ;;  %s1284_s22 = sphi %s1334_s22, %s1792_s22   ;;  %s1280_s21 = sphi %s1332_s21, %s1791_s21  }
   0x4   : > { %s1357_s27 = sadd.s32 1, %s1292_s24   ;;  %s182_s28 = sadd.s32 1, %s1288_s23 }
   0x5   : > { %s179_s29 = ssub.s32 %s1292_s24, %s1357_s27  ;;  %p192_p0 = scmp.ne.s32.totalorder %s1288_s23, %s1284_s22 }
   0x6   : > { %p180_p1 = scmp.eq.s32.totalorder %s179_s29, 0  ;;  %p193_p2 = scmp.eq.s32.totalorder %s1353_s25, 1 }
   0x7   : > { %p198_p3 = scmp.ne.s32.totalorder %s1284_s22, %s1280_s21  ;;  %p199_p4 = scmp.eq.s32.totalorder %s1145_s26, 1 }
   0x8   : > { %s1368_s30 = scalar_select %p180_p1, %s1288_s23, %s182_s28  }
   0x9   : > { %p1370_p5 = por %p193_p2, %p192_p0  ;;  %p1374_p6 = por %p199_p4, %p198_p3 }
   0xa   : > { %p1148_p7 = scmp.ge.s32.totalorder %s1292_s24, 1  ;;  %p261_p8 = scmp.lt.s32.totalorder %s1292_s24, 3 }
   0xc   : > { %p262_p9 = pnand %p1148_p7, %p261_p8 }
   0xd   : > { %p312_p10 = scmp.lt.s32.totalorder (!%p262_p9), %s1353_s25, 1  ;;  %s1295_s15 = smov (!%p262_p9), 64  }
   0xe   : > { %265 = sbr.rel (%p262_p9) target bundleno = 1155 (0x483), region = 44  ;;  %s1172_s20 = sshll.u32 (!%p262_p9), %s1353_s25, 4 }
   0xf   : > { %s1021_s29 = scalar_lea.hbm (!%p262_p9), %s1788_s6, %s1172_s20 }
  0x10   : > { %s1025_s11 = sshll.u32 (!%p262_p9), %s1021_s29, 4  ;;  %s1026_s11 = int_to_ptr.hbm [resolvable:$true] %s1025_s11 }
  0x13   : > { %v1294_v0 = vmov 0   ;;  %s1382_s9 = scalar_select %p312_p10, %s1353_s25, 1  ;;  %vm437_vm0 = vcmask 1042432   ;;  %vm700_vm1 = vcmask 1041409   ;;  %vm702_vm2 = vcmask 1042434  }
  0x14   : > { %1217 = vset.pattern.permute.xlu2 %v1294_v0  ;;  %1218 = vset.pattern.permute.xlu0 %v1294_v0  ;;  %vm704_vm3 = vcmask 1043459   ;;  %vm706_vm4 = vcmask 1044484   ;;  %vm708_vm5 = vcmask 1045509   ;;  %vm710_vm6 = vcmask 1046534  }
  0x15   : > { %s1170_s10 = sshll.u32 %s1382_s9, 6  ;;  %s1391_s14 = sshll.u32 %s1382_s9, 2  ;;  %vm712_vm7 = vcmask 1047559   ;;  %vm833_vm10 = vcmask 130048   ;;  %vm842_vm11 = vcmask 7168   ;;  %vm876_vm12 = vcmask 64512  }
  0x16   : > { %s1388_s13 = scalar_lea.vmem %s1782_s0, %s1170_s10  ;;  %s333_s18 = scalar_lea.vmem %s1786_s4, %s1391_s14 }
  0x17   : > { %v1394_v1 = vld [vmem:[%s1388_s13 + $0x20] sm:$0x7]  ;;  %v1408_v3 = vld [vmem:[%s1388_s13 + $0x8] sm:$0x7]  ;;  %v1413_v5 = vld [vmem:[%s1388_s13 + $0x24] sm:$0x7]  ;;  %s328_s26 = scalar_lea.vmem %s1785_s3, %s1391_s14  ;;  %s320_s10 = scalar_lea.vmem %s1783_s1, %s1391_s14 }
  0x18   : > { %v1397_v2 = vld [vmem:[%s1388_s13] sm:$0x7]  ;;  %371 = vrot.lane.b32.xlu1 %v1394_v1, %s1295_s15  ;;  %359 = vrot.lane.b32.xlu2 %v1408_v3, %s1295_s15  ;;  %v1416_v6 = vld [vmem:[%s1388_s13 + $0x4] sm:$0x7]  ;;  %s324_s16 = scalar_lea.vmem %s1784_s2, %s1391_s14 }
  0x19   : > { %355 = vrot.lane.b32.xlu0 %v1397_v2, %s1295_s15  ;;  %v757_v4 = vld [vmem:[%s333_s18] sm:$0xf]  ;;  %v1419_v7 = vld [vmem:[%s1388_s13 + $0x28] sm:$0x7]  ;;  %v1432_v8 = vld [vmem:[%s1388_s13 + $0x2c] sm:$0x7] }
  0x1a   : > { %759 = vst [vmem:[#allocation1] ss:$4 sm:$0xff] %v757_v4  ;;  %v1435_v9 = vld [vmem:[%s1388_s13 + $0xc] sm:$0x7]  ;;  %v550_v10 = vld [vmem:[%s328_s26] sm:$0x7] }
  0x1b   : > { %v1442_v11 = vld [vmem:[%s1388_s13 + $0x30] sm:$0x7]  ;;  %v344_v13 = vld [vmem:[%s1388_s13 + $0x14] sm:$0x7]  ;;  %v345_v14 = vld [vmem:[%s1388_s13 + $0x18] sm:$0x7] }
  0x1c   : > { %v343_v12 = vld [vmem:[%s1388_s13 + $0x10] sm:$0x7]  ;;  %v1452_v15 = vld [vmem:[%s1388_s13 + $0x34] sm:$0x7]  ;;  %v1455_v16 = vld [vmem:[%s1388_s13 + $0x38] sm:$0x7] }
  0x1d   : > { %v1463_v17 = vld [vmem:[%s1388_s13 + $0x3c] sm:$0x7]  ;;  %v387_v19 = vld [vmem:[%s320_s10] sm:$0x7] }
  0x1e   : > { %v346_v18 = vld [vmem:[%s1388_s13 + $0x1c] sm:$0x7]  ;;  %v1477_v20 = vld [vmem:[%s324_s16] sm:$0x7]  ;;  %v390_v21 = vmul.f32 %v387_v19, %v1408_v3  ;;  %v398_v27 = vmul.f32 %v387_v19, %v1419_v7  ;;  %v396_v37 = vmul.f32 %v387_v19, %v1394_v1  ;;  %v388_v38 = vmul.f32 %v387_v19, %v1397_v2  ;;  %s1157_s13 = sshll.u32 %s1382_s9, 3  ;;  %s309_s9 = sand.u32 1, %s1284_s22  }
  0x1f   : > { %v1491_v40 = vmul.f32 %v387_v19, %v1413_v5  ;;  %v1494_v41 = vmul.f32 %v387_v19, %v1416_v6  ;;  %v1497_v42 = vmul.f32 %v387_v19, %v1432_v8  ;;  %v1500_v44 = vmul.f32 %v387_v19, %v1435_v9  ;;  %s337_s17 = scalar_lea.vmem %s1787_s5, %s1157_s13  ;;  %s1149_s18 = sshll.u32 %s309_s9, 4 }
  0x20   : > { %373 = vrot.lane.b32.xlu1 %v1413_v5, %s1295_s15  ;;  %375 = vrot.lane.b32.xlu2 %v1419_v7, %s1295_s15  ;;  %v1503_v45 = vmul.f32 %v387_v19, %v1442_v11  ;;  %v1505_v46 = vmul.f32 %v387_v19, %v343_v12  ;;  %v1509_v49 = vmul.f32 %v387_v19, %v345_v14  ;;  %s311_s19 = scalar_lea.vmem [#allocation2], %s1149_s18  ;;  %s1010_s12 = scalar_lea.sflag [#allocation3], %s309_s9 }
  0x21   : > { %357 = vrot.lane.b32.xlu0 %v1416_v6, %s1295_s15  ;;  %v760_v30 = vld.sshfl [vmem:[#allocation1] sm:$0xff pattern:$0x73625140]  ;;  %v1512_v50 = vmul.f32 %v387_v19, %v1452_v15  ;;  %v1519_v53 = vmul.f32 %v387_v19, %v1463_v17  ;;  %v1521_v54 = vmul.f32 %v387_v19, %v346_v18  ;;  %v393_v55 = vmul.f32 %v387_v19, %v344_v13  ;;  %s1023_s10 = sshll.u32 %s311_s19, 4  ;;  %s1244_s16 = sshra.s32 %s1026_s11, 4  ;;  %s1024_s10 = int_to_ptr.vmem [resolvable:$true] %s1023_s10  ;;  %s1245_s16 = int_to_ptr.hbm [resolvable:$true] %s1244_s16 }
  0x22   : > { %v1484_v32 = vpack.c.bf16 %v760_v30, %v760_v30  ;;  %v1526_v57 = vmul.f32 %v387_v19, %v1455_v16  ;;  %s1246_s13 = scalar_lea.hbm %s1245_s16, 16  ;;  %p1251_p0 = scmp.lt.s32.totalorder %s1245_s16, %s1788_s6 }
  0x23   : > { %p1247_p11 = scmp.ne.s32.totalorder %s1245_s16, %s1246_s13 }
  0x24   : > { %773 = vmatpush.bf16.xpose.msra.mxu0 %v1484_v32 }
  0x25   : > { %p1248_p12 = pnand %p1247_p11, %p1370_p5 }
  0x27   : > { %p1249_p13 = pneg %p1248_p12 }
  0x28   : > { %377 = vrot.lane.b32.xlu1 %v1432_v8, %s1295_s15  ;;  %553 = vperm.xlu2 %1217, %v550_v10  }
  0x29   : > { %361 = vrot.lane.b32.xlu0 %v1435_v9, %s1295_s15 }
  0x30   : > { %379 = vrot.lane.b32.xlu1 %v1442_v11, %s1295_s15  ;;  %365 = vrot.lane.b32.xlu2 %v344_v13, %s1295_s15 }
  0x31   : > { %363 = vrot.lane.b32.xlu0 %v343_v12, %s1295_s15 }
  0x38   : > { %367 = vrot.lane.b32.xlu1 %v345_v14, %s1295_s15  ;;  %383 = vrot.lane.b32.xlu2 %v1455_v16, %s1295_s15 }
  0x39   : > { %381 = vrot.lane.b32.xlu0 %v1452_v15, %s1295_s15 }
  0x40   : > { %385 = vrot.lane.b32.xlu1 %v1463_v17, %s1295_s15 }
  0x41   : > { %369 = vrot.lane.b32.xlu0 %v346_v18, %s1295_s15  ;;  %s1250_s15 = scalar_lea.hbm %s1788_s6, 32 }
  0x42   : > { %p1252_p1 = scmp.lt.s32.totalorder %s1250_s15, %s1246_s13 }
  0x44   : > { %p1253_p2 = por %p1252_p1, %p1251_p0 }
  0x46   : > { %p1254_p3 = pnand %p1253_p2, %p1249_p13 }
  0x72   : > { %v360_v22 = vpop.permute.xlu2 %359 }
  0x73   : > { %v407_v23 = vmul.f32 %v1477_v20, %v360_v22 }
  0x75   : > { %v423_v24 = vadd.f32 %v407_v23, %v390_v21 }
  0x77   : > { %v452_v25 = vsel %vm437_vm0, %v423_v24, 0.0 }
  0x78   : > { %v453_v26 = vrot.slane %v452_v25, 4 }
  0x7a   : > { %v454_v28 = vadd.f32 %v453_v26, %v452_v25  ;;  %v376_v29 = vpop.permute.xlu2 %375 }
  0x7b   : > { %v415_v31 = vmul.f32 %v1477_v20, %v376_v29 }
  0x7c   : > { %v455_v33 = vrot.slane %v454_v28, 2 }
  0x7d   : > { %v431_v34 = vadd.f32 %v415_v31, %v398_v27 }
  0x7e   : > { %v456_v35 = vadd.f32 %v455_v33, %v454_v28 }
  0x7f   : > { %v508_v36 = vsel %vm437_vm0, %v431_v34, 0.0 }
  0x80   : > { %v509_v39 = vrot.slane %v508_v36, 4  ;;  %v457_v43 = vrot.slane %v456_v35, 1 }
  0x82   : > { %v510_v47 = vadd.f32 %v509_v39, %v508_v36  ;;  %v1507_v48 = vpop.permute.xlu2 %553  ;;  %v1528_v58 = vadd.f32 %v457_v43, %v456_v35 }
  0x83   : > { %v556_v51 = vmul.f32 %v1507_v48, %v1397_v2  ;;  %v557_v52 = vmul.f32 %v1507_v48, %v1416_v6  ;;  %v558_v56 = vmul.f32 %v1507_v48, %v1408_v3  ;;  %v559_v60 = vmul.f32 %v1507_v48, %v1435_v9 }
  0x84   : > { %v511_v59 = vrot.slane %v510_v47, 2  ;;  %v560_v61 = vmul.f32 %v1507_v48, %v343_v12  ;;  %v1534_v62 = vmul.f32 %v1507_v48, %v344_v13  ;;  %v1537_v63 = vmul.f32 %v1507_v48, %v345_v14 }
  0x85   : > { %v1540_v0 = vmul.f32 %v1507_v48, %v346_v18  ;;  %v1544_v2 = vmul.f32 %v1507_v48, %v1394_v1  ;;  %v1548_v3 = vmul.f32 %v1507_v48, %v1413_v5  ;;  %v572_v4 = vsel %vm437_vm0, %v556_v51, 0.0 }
  0x86   : > { %v579_v6 = vsel %vm437_vm0, %v557_v52, 0.0  ;;  %v1554_v12 = vmul.f32 %v1507_v48, %v1419_v7  ;;  %v573_v13 = vrot.slane %v572_v4, 4  ;;  %v586_v18 = vsel %vm437_vm0, %v558_v56, 0.0 }
  0x87   : > { %v580_v14 = vrot.slane %v579_v6, 4  ;;  %v587_v5 = vrot.slane %v586_v18, 4  ;;  %v593_v21 = vsel %vm437_vm0, %v559_v60, 0.0  ;;  %v512_v22 = vadd.f32 %v511_v59, %v510_v47 }
  0x88   : > { %v574_v24 = vadd.f32 %v573_v13, %v572_v4  ;;  %v594_v26 = vrot.slane %v593_v21, 4  ;;  %v1563_v30 = vmul.f32 %v1507_v48, %v1432_v8  ;;  %v1567_v31 = vmul.f32 %v1507_v48, %v1442_v11 }
  0x89   : > { %v581_v25 = vadd.f32 %v580_v14, %v579_v6  ;;  %v588_v29 = vadd.f32 %v587_v5, %v586_v18  ;;  %v1577_v8 = vmul.f32 %v1507_v48, %v1455_v16  ;;  %v600_v11 = vsel %vm437_vm0, %v560_v61, 0.0 }
  0x8a   : > { %v372_v9 = vpop.permute.xlu1 %371  ;;  %v366_v23 = vpop.permute.xlu2 %365  ;;  %v575_v33 = vrot.slane %v574_v24, 2  ;;  %v595_v56 = vadd.f32 %v594_v26, %v593_v21  ;;  %v1585_v16 = vmul.f32 %v1507_v48, %v1463_v17  ;;  %v601_v61 = vrot.slane %v600_v11, 4 }
  0x8b   : > { %v356_v10 = vpop.permute.xlu0 %355  ;;  %v413_v1 = vmul.f32 %v1477_v20, %v372_v9  ;;  %v410_v7 = vmul.f32 %v1477_v20, %v366_v23  ;;  %v582_v34 = vrot.slane %v581_v25, 2  ;;  %v589_v52 = vrot.slane %v588_v29, 2 }
  0x8c   : > { %v405_v19 = vmul.f32 %v1477_v20, %v356_v10  ;;  %v576_v51 = vadd.f32 %v575_v33, %v574_v24  ;;  %v513_v13 = vrot.slane %v512_v22, 1 }
  0x8d   : > { %v429_v27 = vadd.f32 %v413_v1, %v396_v37  ;;  %v426_v39 = vadd.f32 %v410_v7, %v393_v55  ;;  %v1573_v37 = vmul.f32 %v1507_v48, %v1452_v15  ;;  %v583_v15 = vadd.f32 %v582_v34, %v581_v25 }
  0x8e   : > { %v421_v28 = vadd.f32 %v405_v19, %v388_v38  ;;  %v577_v21 = vrot.slane %v576_v51, 1  ;;  %v590_v23 = vadd.f32 %v589_v52, %v588_v29  ;;  %v602_v48 = vadd.f32 %v601_v61, %v600_v11 }
  0x8f   : > { %v494_v35 = vsel %vm437_vm0, %v429_v27, 0.0  ;;  %v473_v47 = vsel %vm437_vm0, %v426_v39, 0.0  ;;  %v584_v26 = vrot.slane %v583_v15, 1  ;;  %v596_v27 = vrot.slane %v595_v56, 2 }
  0x90   : > { %v438_v36 = vsel %vm437_vm0, %v421_v28, 0.0  ;;  %v495_v38 = vrot.slane %v494_v35, 4  ;;  %v474_v6 = vrot.slane %v473_v47, 4  ;;  %v607_v7 = vsel %vm437_vm0, %v1534_v62, 0.0 }
  0x91   : > { %v439_v43 = vrot.slane %v438_v36, 4  ;;  %v1593_v33 = vadd.f32 %v513_v13, %v512_v22  ;;  %v591_v29 = vrot.slane %v590_v23, 1  ;;  %v608_v39 = vrot.slane %v607_v7, 4 }
  0x92   : > { %v496_v59 = vadd.f32 %v495_v38, %v494_v35  ;;  %v374_v55 = vpop.permute.xlu1 %373  ;;  %v475_v1 = vadd.f32 %v474_v6, %v473_v47  ;;  %v597_v11 = vadd.f32 %v596_v27, %v595_v56 }
  0x93   : > { %v440_v60 = vadd.f32 %v439_v43, %v438_v36  ;;  %v358_v4 = vpop.permute.xlu0 %357  ;;  %v414_v9 = vmul.f32 %v1477_v20, %v374_v55  ;;  %v603_v36 = vrot.slane %v602_v48, 2 }
  0x94   : > { %v406_v10 = vmul.f32 %v1477_v20, %v358_v4  ;;  %v497_v14 = vrot.slane %v496_v59, 2  ;;  %v476_v35 = vrot.slane %v475_v1, 2 }
  0x95   : > { %v441_v18 = vrot.slane %v440_v60, 2  ;;  %v430_v19 = vadd.f32 %v414_v9, %v1491_v40  ;;  %v609_v9 = vadd.f32 %v608_v39, %v607_v7  ;;  %v604_v13 = vadd.f32 %v603_v36, %v602_v48 }
  0x96   : > { %v422_v5 = vadd.f32 %v406_v10, %v1494_v41  ;;  %v498_v24 = vadd.f32 %v497_v14, %v496_v59  ;;  %v1595_v41 = vadd.f32 %v577_v21, %v576_v51  ;;  %v1597_v59 = vadd.f32 %v584_v26, %v583_v15 }
  0x97   : > { %v442_v25 = vadd.f32 %v441_v18, %v440_v60  ;;  %v501_v28 = vsel %vm437_vm0, %v430_v19, 0.0  ;;  %v477_v51 = vadd.f32 %v476_v35, %v475_v1  ;;  %v614_v15 = vsel %vm437_vm0, %v1537_v63, 0.0 }
  0x98   : > { %v445_v17 = vsel %vm437_vm0, %v422_v5, 0.0  ;;  %v502_v34 = vrot.slane %v501_v28, 4  ;;  %v499_v60 = vrot.slane %v498_v24, 1  ;;  %v598_v18 = vrot.slane %v597_v11, 1 }
  0x99   : > { %v446_v40 = vrot.slane %v445_v17, 4  ;;  %v443_v55 = vrot.slane %v442_v25, 1  ;;  %v610_v19 = vrot.slane %v609_v9, 2  ;;  %v615_v26 = vrot.slane %v614_v15, 4 }
  0x9a   : > { %v503_v38 = vadd.f32 %v502_v34, %v501_v28  ;;  %v378_v47 = vpop.permute.xlu1 %377  ;;  %v621_v1 = vsel %vm437_vm0, %v1540_v0, 0.0  ;;  %v478_v28 = vrot.slane %v477_v51, 1  ;;  %v605_v63 = vrot.slane %v604_v13, 1 }
  0x9b   : > { %v447_v43 = vadd.f32 %v446_v40, %v445_v17  ;;  %v362_v52 = vpop.permute.xlu0 %361  ;;  %v416_v62 = vmul.f32 %v1477_v20, %v378_v47  ;;  %v1609_v17 = vadd.f32 %v591_v29, %v590_v23  ;;  %v611_v48 = vadd.f32 %v610_v19, %v609_v9 }
  0x9c   : > { %v408_v22 = vmul.f32 %v1477_v20, %v362_v52  ;;  %v504_v4 = vrot.slane %v503_v38, 2  ;;  %v616_v7 = vadd.f32 %v615_v26, %v614_v15  ;;  %v1611_v34 = vadd.f32 %v499_v60, %v498_v24 }
  0x9d   : > { %v448_v6 = vrot.slane %v447_v43, 2  ;;  %v432_v10 = vadd.f32 %v416_v62, %v1497_v42  ;;  %v1617_v23 = vadd.f32 %v598_v18, %v597_v11 }
  0x9e   : > { %v424_v61 = vadd.f32 %v408_v22, %v1500_v44  ;;  %v505_v14 = vadd.f32 %v504_v4, %v503_v38  ;;  %v622_v38 = vrot.slane %v621_v1, 4  ;;  %v1615_v22 = vadd.f32 %v478_v28, %v477_v51 }
  0x9f   : > { %v449_v56 = vadd.f32 %v448_v6, %v447_v43  ;;  %v515_v5 = vsel %vm437_vm0, %v432_v10, 0.0  ;;  %v444_v43 = vadd.f32 %v443_v55, %v442_v25  ;;  %v617_v29 = vrot.slane %v616_v7, 2 }
  0xa0   : > { %v459_v21 = vsel %vm437_vm0, %v424_v61, 0.0  ;;  %v516_v27 = vrot.slane %v515_v5, 4  ;;  %v506_v47 = vrot.slane %v505_v14, 1  ;;  %v1621_v4 = vadd.f32 %v605_v63, %v604_v13 }
  0xa1   : > { %v450_v42 = vrot.slane %v449_v56, 1  ;;  %v460_v44 = vrot.slane %v459_v21, 4  ;;  %v612_v6 = vrot.slane %v611_v48, 1  ;;  %v623_v55 = vadd.f32 %v622_v38, %v621_v1 }
  0xa2   : > { %v517_v40 = vadd.f32 %v516_v27, %v515_v5  ;;  %v380_v36 = vpop.permute.xlu1 %379  ;;  %v628_v10 = vsel %vm437_vm0, %v1544_v2, 0.0  ;;  %v1625_v61 = vadd.f32 %v506_v47, %v505_v14  ;;  %v635_v2 = vsel %vm437_vm0, %v1548_v3, 0.0 }
  0xa3   : > { %v461_v35 = vadd.f32 %v460_v44, %v459_v21  ;;  %v364_v39 = vpop.permute.xlu0 %363  ;;  %v417_v0 = vmul.f32 %v1477_v20, %v380_v36  ;;  %v451_v62 = vadd.f32 %v450_v42, %v449_v56  ;;  %v629_v15 = vrot.slane %v628_v10, 4 }
  0xa4   : > { %v409_v52 = vmul.f32 %v1477_v20, %v364_v39  ;;  %v518_v9 = vrot.slane %v517_v40, 2  ;;  %v618_v56 = vadd.f32 %v617_v29, %v616_v7  ;;  %v1632_v18 = vadd.f32 %v612_v6, %v611_v48 }
  0xa5   : > { %v433_v24 = vadd.f32 %v417_v0, %v1503_v45  ;;  %v462_v25 = vrot.slane %v461_v35, 2  ;;  %v1630_v45 = vsel %vm700_vm1, %v451_v62, %v444_v43  ;;  %v624_v19 = vrot.slane %v623_v55, 2 }
  0xa6   : > { %v425_v60 = vadd.f32 %v409_v52, %v1505_v46  ;;  %v630_v5 = vadd.f32 %v629_v15, %v628_v10  ;;  %v1636_v14 = vadd.f32 %v518_v9, %v517_v40  ;;  %v636_v44 = vrot.slane %v635_v2, 4 }
  0xa7   : > { %v522_v51 = vsel %vm437_vm0, %v433_v24, 0.0  ;;  %v1638_v21 = vadd.f32 %v462_v25, %v461_v35  ;;  %v625_v42 = vadd.f32 %v624_v19, %v623_v55  ;;  %v642_v28 = vsel %vm437_vm0, %v1554_v12, 0.0 }
  0xa8   : > { %v466_v11 = vsel %vm437_vm0, %v425_v60, 0.0  ;;  %v523_v46 = vrot.slane %v522_v51, 4  ;;  %v631_v27 = vrot.slane %v630_v5, 2  ;;  %v619_v48 = vrot.slane %v618_v56, 1 }
  0xa9   : > { %v467_v13 = vrot.slane %v466_v11, 4  ;;  %v643_v7 = vrot.slane %v642_v28, 4  ;;  %v649_v36 = vsel %vm437_vm0, %v1563_v30, 0.0  ;;  %v637_v40 = vadd.f32 %v636_v44, %v635_v2 }
  0xaa   : > { %v524_v26 = vadd.f32 %v523_v46, %v522_v51  ;;  %v632_v3 = vadd.f32 %v631_v27, %v630_v5  ;;  %v650_v38 = vrot.slane %v649_v36, 4  ;;  %v520_v35 = vrot.slane %v1636_v14, 1  ;;  %v368_v46 = vpop.permute.xlu1 %367 }
  0xab   : > { %v468_v1 = vadd.f32 %v467_v13, %v466_v11  ;;  %v626_v43 = vrot.slane %v625_v42, 1  ;;  %v644_v47 = vadd.f32 %v643_v7, %v642_v28  ;;  %v656_v0 = vsel %vm437_vm0, %v1567_v31, 0.0  ;;  %v382_v2 = vpop.permute.xlu0 %381 }
  0xac   : > { %v525_v63 = vrot.slane %v524_v26, 2  ;;  %v464_v52 = vrot.slane %v1638_v21, 1  ;;  %v633_v12 = vrot.slane %v632_v3, 1  ;;  %v638_v62 = vrot.slane %v637_v40, 2 }
  0xad   : > { %v469_v39 = vrot.slane %v468_v1, 2  ;;  %v651_v29 = vadd.f32 %v650_v38, %v649_v36  ;;  %v620_v60 = vadd.f32 %v619_v48, %v618_v56  ;;  %v645_v30 = vrot.slane %v644_v47, 2 }
  0xae   : > { %v1648_v24 = vadd.f32 %v525_v63, %v524_v26  ;;  %v657_v6 = vrot.slane %v656_v0, 4  ;;  %v639_v25 = vadd.f32 %v638_v62, %v637_v40  ;;  %v663_v10 = vsel %vm437_vm0, %v1573_v37, 0.0 }
  0xaf   : > { %v1650_v9 = vadd.f32 %v469_v39, %v468_v1  ;;  %v652_v55 = vrot.slane %v651_v29, 2  ;;  %v627_v51 = vadd.f32 %v626_v43, %v625_v42  ;;  %v634_v11 = vadd.f32 %v633_v12, %v632_v3 }
  0xb0   : > { %v646_v31 = vadd.f32 %v645_v30, %v644_v47  ;;  %v658_v15 = vadd.f32 %v657_v6, %v656_v0  ;;  %v640_v13 = vrot.slane %v639_v25, 1  ;;  %v664_v5 = vrot.slane %v663_v10, 4 }
  0xb1   : > { %v653_v19 = vadd.f32 %v652_v55, %v651_v29  ;;  %v670_v56 = vsel %vm437_vm0, %v1577_v8, 0.0  ;;  %v677_v44 = vsel %vm437_vm0, %v1585_v16, 0.0  ;;  %v701_v39 = vsel %vm700_vm1, %v1597_v59, %v1595_v41 }
  0xb2   : > { %v647_v26 = vrot.slane %v646_v31, 1  ;;  %v659_v1 = vrot.slane %v658_v15, 2  ;;  %v671_v27 = vrot.slane %v670_v56, 4  ;;  %v641_v28 = vadd.f32 %v640_v13, %v639_v25 }
  0xb3   : > { %v654_v37 = vrot.slane %v653_v19, 1  ;;  %v665_v42 = vadd.f32 %v664_v5, %v663_v10  ;;  %v678_v63 = vrot.slane %v677_v44, 4  ;;  %v703_v16 = vsel %vm702_vm2, %v1609_v17, %v701_v39  ;;  %v386_v10 = vpop.permute.xlu1 %385 }
  0xb4   : > { %v648_v48 = vadd.f32 %v647_v26, %v646_v31  ;;  %v660_v7 = vadd.f32 %v659_v1, %v658_v15  ;;  %v672_v36 = vadd.f32 %v671_v27, %v670_v56  ;;  %v705_v12 = vsel %vm704_vm3, %v1617_v23, %v703_v16  ;;  %v384_v23 = vpop.permute.xlu2 %383 }
  0xb5   : > { %v655_v3 = vadd.f32 %v654_v37, %v653_v19  ;;  %v666_v8 = vrot.slane %v665_v42, 2  ;;  %v679_v40 = vadd.f32 %v678_v63, %v677_v44  ;;  %v707_v41 = vsel %vm706_vm4, %v1621_v4, %v705_v12  ;;  %v370_v19 = vpop.permute.xlu0 %369 }
  0xb6   : > { %v661_v38 = vrot.slane %v660_v7, 1  ;;  %v673_v43 = vrot.slane %v672_v36, 2  ;;  %v709_v6 = vsel %vm708_vm5, %v1632_v18, %v707_v41  ;;  %v714_v55 = vsel %vm700_vm1, %v641_v28, %v634_v11 }
  0xb7   : > { %v667_v47 = vadd.f32 %v666_v8, %v665_v42  ;;  %v680_v0 = vrot.slane %v679_v40, 2  ;;  %v711_v25 = vsel %vm710_vm6, %v620_v60, %v709_v6  ;;  %v715_v4 = vsel %vm702_vm2, %v648_v48, %v714_v55  ;;  %v761_v60 = vld.sshfl [vmem:[#allocation1 + $0x8] sm:$0xff pattern:$0x73625140] }
  0xb8   : > { %v662_v62 = vadd.f32 %v661_v38, %v660_v7  ;;  %v674_v29 = vadd.f32 %v673_v43, %v672_v36  ;;  %v713_v13 = vsel %vm712_vm7, %v627_v51, %v711_v25  ;;  %v716_v56 = vsel %vm704_vm3, %v655_v3, %v715_v4 }
  0xb9   : > { %v668_v59 = vrot.slane %v667_v47, 1  ;;  %v681_v30 = vadd.f32 %v680_v0, %v679_v40  ;;  %v411_v18 = vmul.f32 %v1477_v20, %v368_v46  ;;  %v418_v26 = vmul.f32 %v1477_v20, %v382_v2 }
  0xba   : > { %v675_v17 = vrot.slane %v674_v29, 1  ;;  %v717_v11 = vsel %vm706_vm4, %v662_v62, %v716_v56  ;;  %v419_v27 = vmul.f32 %v1477_v20, %v384_v23  ;;  %v420_v44 = vmul.f32 %v1477_v20, %v386_v10 }
  0xbb   : > { %v669_v31 = vadd.f32 %v668_v59, %v667_v47  ;;  %v682_v15 = vrot.slane %v681_v30, 1  ;;  %v427_v28 = vadd.f32 %v411_v18, %v1509_v49  ;;  %v434_v37 = vadd.f32 %v418_v26, %v1512_v50 }
  0xbc   : > { %v676_v5 = vadd.f32 %v675_v17, %v674_v29  ;;  %v412_v42 = vmul.f32 %v1477_v20, %v370_v19  ;;  %v435_v2 = vadd.f32 %v419_v27, %v1526_v57  ;;  %v436_v63 = vadd.f32 %v420_v44, %v1519_v53 }
  0xbd   : > { %v683_v1 = vadd.f32 %v682_v15, %v681_v30  ;;  %v718_v51 = vsel %vm708_vm5, %v669_v31, %v717_v11  ;;  %v1686_v48 = vpack.c.bf16 %v761_v60, %v761_v60  ;;  %v480_v36 = vsel %vm437_vm0, %v427_v28, 0.0 }
  0xbe   : > { %v719_v46 = vsel %vm710_vm6, %v676_v5, %v718_v51  ;;  %v529_v39 = vsel %vm437_vm0, %v434_v37, 0.0  ;;  %v428_v49 = vadd.f32 %v412_v42, %v1521_v54  ;;  %v481_v50 = vrot.slane %v480_v36, 4 }
  0xbf   : > { %v720_v7 = vsel %vm712_vm7, %v683_v1, %v719_v46  ;;  %v530_v8 = vrot.slane %v529_v39, 4  ;;  %v536_v20 = vsel %vm437_vm0, %v435_v2, 0.0  ;;  %787 = vmatpush.bf16.xpose.msra.mxu1 %v1686_v48  ;;  %v471_v57 = vrot.slane %v1650_v9, 1 }
  0xc0   : > { %v755_v3 = vpack.c.bf16 %v720_v7, %v713_v13  ;;  %v537_v53 = vrot.slane %v536_v20, 4  ;;  %v543_v40 = vsel %vm437_vm0, %v436_v63, 0.0  ;;  %v487_v38 = vsel %vm437_vm0, %v428_v49, 0.0 }
  0xc1   : > { %v482_v43 = vadd.f32 %v481_v50, %v480_v36  ;;  %v531_v16 = vadd.f32 %v530_v8, %v529_v39  ;;  %v544_v47 = vrot.slane %v543_v40, 4  ;;  %v488_v54 = vrot.slane %v487_v38, 4 }
  0xc2   : > { %774 = vmatmul.bf16.vlgmr.msra.gmra.mxu0 %v755_v3  ;;  %801 = vmatpush.bf16.xpose.msra.mxu2 %v755_v3  ;;  %v746_v0 = vsel %vm700_vm1, %v1625_v61, %v1611_v34  ;;  %v465_v12 = vadd.f32 %v464_v52, %v1638_v21  ;;  %v527_v62 = vrot.slane %v1648_v24, 1  ;;  %v538_v29 = vadd.f32 %v537_v53, %v536_v20 }
  0xc3   : > { %v483_v41 = vrot.slane %v482_v43, 2  ;;  %v532_v59 = vrot.slane %v531_v16, 2  ;;  %v545_v30 = vadd.f32 %v544_v47, %v543_v40  ;;  %v489_v6 = vadd.f32 %v488_v54, %v487_v38 }
  0xc4   : > { %v521_v17 = vadd.f32 %v520_v35, %v1636_v14  ;;  %v472_v25 = vadd.f32 %v471_v57, %v1650_v9  ;;  %v539_v55 = vrot.slane %v538_v29, 2  ;;  %v740_v34 = vsel %vm702_vm2, %v1528_v58, %v1630_v45 }
  0xc5   : > { %v484_v61 = vadd.f32 %v483_v41, %v482_v43  ;;  %v533_v21 = vadd.f32 %v532_v59, %v531_v16  ;;  %v546_v52 = vrot.slane %v545_v30, 2  ;;  %v490_v23 = vrot.slane %v489_v6, 2 }
  0xc6   : > { %v528_v10 = vadd.f32 %v527_v62, %v1648_v24  ;;  %v540_v31 = vadd.f32 %v539_v55, %v538_v29  ;;  %v741_v15 = vsel %vm704_vm3, %v465_v12, %v740_v34  ;;  %v747_v13 = vsel %vm702_vm2, %v1593_v33, %v746_v0 }
  0xc7   : > { %v485_v14 = vrot.slane %v484_v61, 1  ;;  %v534_v35 = vrot.slane %v533_v21, 1  ;;  %v547_v9 = vadd.f32 %v546_v52, %v545_v30  ;;  %v491_v4 = vadd.f32 %v490_v23, %v489_v6 }
  0xc8   : > { %v541_v19 = vrot.slane %v540_v31, 1  ;;  %v742_v58 = vsel %vm706_vm4, %v472_v25, %v741_v15  ;;  %v748_v45 = vsel %vm704_vm3, %v521_v17, %v747_v13  ;;  %v1296_v13 = vmov 1  }
  0xc9   : > { %802 = vmatmul.bf16.vlgmr.msra.gmra.mxu2 %v1484_v32  ;;  %v486_v5 = vadd.f32 %v485_v14, %v484_v61  ;;  %v535_v56 = vadd.f32 %v534_v35, %v533_v21  ;;  %v548_v24 = vrot.slane %v547_v9, 1  ;;  %v492_v18 = vrot.slane %v491_v4, 1 }
  0xca   : > { %v542_v26 = vadd.f32 %v541_v19, %v540_v31  ;;  %v749_v60 = vsel %vm706_vm4, %v528_v10, %v748_v45  ;;  %v743_v11 = vsel %vm708_vm5, %v1615_v22, %v742_v58  ;;  %v829_v22 = vld [vmem:[%s337_s17] sm:$0xff] }
  0xcb   : > { %v493_v33 = vadd.f32 %v492_v18, %v491_v4  ;;  %v549_v1 = vadd.f32 %v548_v24, %v547_v9  ;;  %v750_v27 = vsel %vm708_vm5, %v535_v56, %v749_v60  ;;  %v744_v32 = vsel %vm710_vm6, %v486_v5, %v743_v11  ;;  %844 = vxpose.xlu1.b32.start.end [1/1] (short) (narrow) %v829_v22, 16 }
  0xcc   : > { %v751_v44 = vsel %vm710_vm6, %v542_v26, %v750_v27  ;;  %vm830_vm9 = vcmp.gt.f32.partialorder %v829_v22, 0.0  ;;  %v912_v10 = vpack.c.bf16 %v829_v22, %v829_v22 }
  0xcd   : > { %v1725_v51 = vsel %vm712_vm7, %v493_v33, %v744_v32  ;;  %v1728_v28 = vsel %vm712_vm7, %v549_v1, %v751_v44 }
  0xce   : > { %v756_v37 = vpack.c.bf16 %v1728_v28, %v1725_v51 }
  0xd0   : > { %788 = vmatmul.bf16.vlgmr.msra.gmra.mxu1 %v756_v37  ;;  %814 = vmatpush.bf16.xpose.msra.mxu3 %v756_v37 }
  0xd7   : > { %815 = vmatmul.bf16.vlgmr.msra.gmra.mxu3 %v1686_v48 }
 0x11e   : > { %1219 = vset.pattern.permute.xlu1 %v1296_v13 }
 0x13f   : > { %v775_v47 = vpop.f32.mrf.mxu0 }
 0x147   : > { %v777_v0 = vpop.f32.mrf.mxu0 }
 0x14c   : > { %v803_v42 = vpop.f32.mrf.mxu2 }
 0x14d   : > { %v789_v16 = vpop.f32.mrf.mxu1 }
 0x14e   : > { %v790_v12 = vadd.f32 %v789_v16, %v775_v47 }
 0x150   : > { %v822_v29 = vmul.f32 0.01, %v790_v12  ;;  %vm820_vm13 = vcmp.gt.f32.partialorder %v790_v12, 0.0 }
 0x152   : > { %v824_v59 = vsel %vm820_vm13, %v790_v12, %v822_v29 }
 0x154   : > { %v805_v46 = vpop.f32.mrf.mxu2 }
 0x155   : > { %v791_v54 = vpop.f32.mrf.mxu1 }
 0x156   : > { %v792_v62 = vadd.f32 %v791_v54, %v777_v0 }
 0x158   : > { %v823_v41 = vmul.f32 0.01, %v792_v62  ;;  %vm821_vm14 = vcmp.gt.f32.partialorder %v792_v62, 0.0 }
 0x15a   : > { %v816_v2 = vpop.f32.mrf.mxu3  ;;  %v825_v6 = vsel %vm821_vm14, %v792_v62, %v823_v41 }
 0x15b   : > { %v817_v63 = vadd.f32 %v816_v2, %v803_v42 }
 0x15d   : > { %vm826_vm8 = vcmp.gt.f32.partialorder %v817_v63, 0.0  ;;  %v827_v7 = vmul.f32 0.01, %v817_v63 }
 0x15f   : > { %v828_v36 = vsel %vm826_vm8, %v817_v63, %v827_v7 }
 0x160   : > { %v837_v39 = vperm.slane %v828_v36, 1  ;;  %v831_v49 = vperm.slane %v828_v36, 0 }
 0x162   : > { %v818_v3 = vpop.f32.mrf.mxu3  ;;  %v838_v48 = vsel %vm830_vm9, %v837_v39, -1e+30  ;;  %v832_v50 = vsel %vm830_vm9, %v831_v49, -1e+30 }
 0x163   : > { %v839_v8 = vsel %vm833_vm10, %v838_v48, -inf  ;;  %v834_v20 = vsel %vm833_vm10, %v832_v50, -inf }
 0x164   : > { %840 = vmax.xlane.f32.xlu0 %v839_v8  ;;  %835 = vmax.xlane.f32.xlu2 %v834_v20 }
 0x16f   : > { %v860_v57 = vpop.trf.xlu1 }
 0x177   : > { %v861_v53 = vpop.trf.xlu1 }
 0x1d7   : > { %v841_v40 = vpop.xlane.xlu0 %840  ;;  %v836_v38 = vpop.xlane.xlu2 %835 }
 0x1d8   : > { %v843_v43 = vsel %vm842_vm11, %v836_v38, %v841_v40 }
 0x1d9   : > { %898 = vmatpush.msrb.mxu0 %v843_v43  ;;  %1173 = vmatpush.msrb.mxu1 %v843_v43 }
 0x1da   : > { %1158 = vmatmul.msk.f32.vlgmr.msrb.gmra.mxu0 %vm876_vm12, %v860_v57  ;;  %1159 = vmatmul.msk.f32.vlgmr.msrb.gmra.mxu1 %vm876_vm12, %v861_v53 }
 0x257   : > { %v900_v30 = vpop.f32.mrf.mxu0  ;;  %v903_v17 = vpop.f32.mrf.mxu1 }
 0x258   : > { %v906_v25 = vsub.f32 %v824_v59, %v900_v30  ;;  %v907_v55 = vsub.f32 %v825_v6, %v903_v17 }
 0x25a   : > { %v908_v34 = vmul.f32 1.442695, %v906_v25  ;;  %v910_v61 = vmul.f32 1.442695, %v907_v55 }
 0x25c   : > { %1222 = vpow2.f32 %v908_v34 }
 0x25d   : > { %1224 = vpow2.f32 %v910_v61 }
 0x262   : > { %v1223_v21 = vpop.eup %1222 }
 0x263   : > { %v1225_v52 = vpop.eup %1224 }
 0x264   : > { %v913_v23 = vpack.c.bf16 %v1225_v52, %v1223_v21 }
 0x266   : > { %924 = vmatpush.bf16.msra.mxu1 %v913_v23 }
 0x269   : > { %1160 = vmatmul.msk.bf16.vlgmr.msra.gmra.mxu1 %vm833_vm10, %v912_v10 }
 0x2e6   : > { %v926_v31 = vpop.f32.mrf.mxu1 }
 0x2e7   : > { %945 = vmatpush.msrb.mxu2 %v926_v31 }
 0x2e8   : > { %1161 = vmatmul.msk.f32.vlgmr.msrb.gmra.mxu2 %vm876_vm12, %v860_v57 }
 0x2ee   : > { %v928_v15 = vpop.f32.mrf.mxu1 }
 0x2f0   : > { %1162 = vmatmul.msk.f32.gmra.mxu2 %vm876_vm12, %v861_v53 }
 0x36b   : > { %v947_v14 = vpop.f32.mrf.mxu2 }
 0x36c   : > { %1226 = vrcp.f32 %v947_v14 }
 0x372   : > { %v1227_v35 = vpop.eup %1226 }
 0x373   : > { %v950_v9 = vpop.f32.mrf.mxu2  ;;  %v955_v4 = vmul.f32 %v1227_v35, %v1223_v21 }
 0x374   : > { %1228 = vrcp.f32 %v950_v9 }
 0x375   : > { %970 = vperm.xlu1 %1219, %v955_v4   ;;  %959 = vperm.xlu2 %1217, %v955_v4  }
 0x37a   : > { %v1229_v19 = vpop.eup %1228 }
 0x37b   : > { %v956_v58 = vmul.f32 %v1229_v19, %v1225_v52 }
 0x37d   : > { %1220 = vset.pattern.permute.xlu2 %v1296_v13  ;;  %964 = vperm.xlu0 %1218, %v956_v58  }
 0x37e   : > { %974 = vperm.xlu2 %1220, %v956_v58  }
 0x385   : > { %1221 = vset.pattern.permute.xlu0 %v1296_v13 }
 0x3cf   : > { %v960_v45 = vpop.permute.xlu2 %959 }
 0x3d0   : > { %v967_v33 = vmul.f32 %v960_v45, %v1725_v51 }
 0x3d8   : > { %v975_v5 = vpop.permute.xlu2 %974 }
 0x3d9   : > { %v978_v24 = vmul.f32 %v975_v5, %v1728_v28 }
 0x3e7   : > { %v971_v56 = vpop.permute.xlu1 %970 }
 0x3e8   : > { %v977_v18 = vmul.f32 %v971_v56, %v1725_v51 }
 0x3ea   : > { %v980_v26 = vpack.c.bf16 %v978_v24, %v977_v18 }
 0x3ec   : > { %1001 = vmatpush.bf16.msra.mxu0 %v980_v26 }
 0x3ef   : > { %v965_v60 = vpop.permute.xlu0 %964  ;;  %1164 = vmatmul.msk.bf16.vlgmr.msra.gmra.mxu0 %vm833_vm10, %v912_v10 }
 0x3f0   : > { %v968_v1 = vmul.f32 %v965_v60, %v1728_v28 }
 0x3f2   : > { %v979_v11 = vpack.c.bf16 %v968_v1, %v967_v33 }
 0x3f4   : > { %988 = vmatpush.bf16.msrb.mxu3 %v979_v11 }
 0x3f7   : > { %1163 = vmatmul.msk.bf16.vlgmr.msrb.gmra.mxu3 %vm833_vm10, %v912_v10 }
 0x46c   : > { %v1003_v27 = vpop.f32.mrf.mxu0 }
 0x46d   : > { %1008 = vst [vmem:[%s311_s19 + $0x8] sm:$0xff] %v1003_v27 }
 0x474   : > { %v1005_v32 = vpop.f32.mrf.mxu0 }
 0x47a   : > { %v990_v44 = vpop.f32.mrf.mxu3 }
 0x47b   : > { %1007 = vst [vmem:[%s311_s19] sm:$0xff] %v990_v44 }
 0x47c   : > { %1257 = shalt.err (!%p1254_p3)
}
 0x47d   : > { %1174 = dma.vmem_to_hbm [thread:$0]  (%p1370_p5), %s1024_s10, 256, %s1026_s11, %s1010_s12  }
 0x482   : > { %v992_v51 = vpop.f32.mrf.mxu3 }
 0x483 PF: > { %p1180_p4 = scmp.ge.s32.totalorder %s1292_s24, 2  ;;  %s1037_s9 = sand.u32 1, %s1280_s21  }
 0x484   : > { %s1038_s19 = scalar_lea.sflag [#allocation3], %s1037_s9 }
 0x485   : > { %p1177_p7 = pnand %p1180_p4, %p1374_p6 }
 0x487   : > { %p1178_p8 = pneg %p1177_p7 }
 0x489   : > { %1275 = dma.done.wait (%p1178_p8), %s1038_s19, 256  }
 0x48a   : > { %1277 = vsyncadd (%p1178_p8), %s1038_s19, 4294967040  ;;  %p16_p9 = scmp.ge.s32.totalorder %s1357_s27, 4   ;;  %s1791_s21 = smov %s1284_s22 }
 0x48b   : > { %s1792_s22 = smov %s1288_s23  ;;  %s1793_s23 = smov %s1368_s30 }
 0x48c   : > { %s1794_s24 = smov %s1357_s27  ;;  %18 = sbr.rel (!%p16_p9) target bundleno = 3 (0x3), region = 94 }
 0x491   :  { %1044 = vsyncpa [#allocation3], 1 }
 0x492   :  { %1046 = vsyncpa [#allocation3 + $0x1], 1 }

</bundles_post_ra>
